<compile_context>
chip_gen: v5e
topology: v5e:2x2
jax: 0.10.0
libtpu: 0.0.40
codegen_flags: <defaults>
</compile_context>

<pallas_src>
import functools

import jax
import jax.numpy as jnp
from jax.experimental import pallas as pl
from jax.experimental.pallas import tpu as pltpu

LANE = 128
SUBLANE = 8


def _round_up(n: int, m: int) -> int:
    return ((n + m - 1) // m) * m


def actor_kernel(x_ref, w1_ref, b1_ref, w2_ref, b2_ref, w3_ref, o_ref):
    # Biases are read once per grid step (no in-kernel loop, so no repeated
    # broadcast_in_dim) and kept in f32 for the VPU work.
    b1 = b1_ref[...].astype(jnp.float32)
    b2 = b2_ref[...].astype(jnp.float32)

    # Layer 1: Linear + ReLU  (bf16 operands, f32 MXU accumulation, f32 VPU)
    h1 = jnp.dot(x_ref[...], w1_ref[...], preferred_element_type=jnp.float32)
    h1 = jnp.maximum(h1 + b1, 0.0)

    # Layer 2: Linear + ReLU
    h2 = jnp.dot(h1.astype(w2_ref.dtype), w2_ref[...],
                 preferred_element_type=jnp.float32)
    h2 = jnp.maximum(h2 + b2, 0.0)

    # Layer 3: Linear (no bias, no activation) -> lane-dense (TB, 128) store.
    o_ref[...] = jnp.dot(h2.astype(w3_ref.dtype), w3_ref[...],
                         preferred_element_type=jnp.float32).astype(o_ref.dtype)


@functools.partial(jax.jit, static_argnames=("compute_dtype",))
def actor_forward(x, params, compute_dtype=jnp.bfloat16):
    """x: (B, state_dim) float32. params: weights stored (in, out), biases (1, out)."""
    w1, b1, w2, b2, w3 = (params["w1"], params["b1"], params["w2"],
                          params["b2"], params["w3"])
    B, state_dim = x.shape
    hidden = w1.shape[1]
    h2_dim = w2.shape[1]
    action_dim = w3.shape[1]

    # Pad feature dims to a full 128-lane width (zero padding is exact: padded
    # input columns hit zero weight rows, padded bias lanes are zero, ReLU(0)=0).
    s_pad = _round_up(state_dim, LANE)
    h_pad = _round_up(hidden, LANE)
    h2_pad = _round_up(h2_dim, LANE)
    a_pad = _round_up(action_dim, LANE)

    # Batch tile: multiple of 8, capped at 512 (fits comfortably in VMEM even on
    # v7x's 64 MiB with double-buffered x/out blocks).
    tb = min(512, _round_up(B, SUBLANE))
    b_pad = _round_up(B, tb)
    num_tiles = pl.cdiv(b_pad, tb)

    cd = compute_dtype
    xp = jnp.zeros((b_pad, s_pad), cd).at[:B, :state_dim].set(x.astype(cd))
    w1p = jnp.zeros((s_pad, h_pad), cd).at[:state_dim, :hidden].set(w1.astype(cd))
    b1p = jnp.zeros((1, h_pad), jnp.float32).at[:, :hidden].set(b1.astype(jnp.float32))
    w2p = jnp.zeros((h_pad, h2_pad), cd).at[:hidden, :h2_dim].set(w2.astype(cd))
    b2p = jnp.zeros((1, h2_pad), jnp.float32).at[:, :h2_dim].set(b2.astype(jnp.float32))
    w3p = jnp.zeros((h2_pad, a_pad), cd).at[:h2_dim, :action_dim].set(w3.astype(cd))

    const2d = lambda shape: pl.BlockSpec(shape, lambda i: (0, 0))

    out_padded = pl.pallas_call(
        actor_kernel,
        out_shape=jax.ShapeDtypeStruct((b_pad, a_pad), jnp.float32),
        grid=(num_tiles,),
        in_specs=[
            pl.BlockSpec((tb, s_pad), lambda i: (i, 0)),   # x: streamed per tile
            const2d((s_pad, h_pad)),                       # weights/biases stay
            const2d((1, h_pad)),                           # VMEM-resident across
            const2d((h_pad, h2_pad)),                      # the whole grid
            const2d((1, h2_pad)),
            const2d((h2_pad, a_pad)),
        ],
        out_specs=pl.BlockSpec((tb, a_pad), lambda i: (i, 0)),
        compiler_params=pltpu.CompilerParams(
            dimension_semantics=("parallel",)),
    )(xp, w1p, b1p, w2p, b2p, w3p)

    return out_padded[:B, :action_dim]


def init_actor_params(key, state_dim, hidden_size, action_dim, init_w=0.003):
    """Synthetic init mirroring linear_layer_init (uniform +-init_w on weights).
    Biases use PyTorch Linear default uniform(-1/sqrt(fan_in), +1/sqrt(fan_in)).
    Weights stored as (in_features, out_features), i.e. already transposed."""
    k1, k2, k3, kb1, kb2 = jax.random.split(key, 5)
    h2 = hidden_size // 2
    u = lambda k, shape, w: jax.random.uniform(k, shape, jnp.float32, -w, w)
    return {
        "w1": u(k1, (state_dim, hidden_size), init_w),
        "b1": u(kb1, (1, hidden_size), 1.0 / float(jnp.sqrt(state_dim))),
        "w2": u(k2, (hidden_size, h2), init_w),
        "b2": u(kb2, (1, h2), 1.0 / float(jnp.sqrt(hidden_size))),
        "w3": u(k3, (h2, action_dim), init_w),
    }


def actor_ref(x, params, compute_dtype=jnp.float32):
    """Pure-JAX reference with the same operand dtype as the kernel."""
    cd = compute_dtype
    h1 = jnp.dot(x.astype(cd), params["w1"].astype(cd),
                 preferred_element_type=jnp.float32) + params["b1"]
    h1 = jnp.maximum(h1, 0.0)
    h2 = jnp.dot(h1.astype(cd), params["w2"].astype(cd),
                 preferred_element_type=jnp.float32) + params["b2"]
    h2 = jnp.maximum(h2, 0.0)
    return jnp.dot(h2.astype(cd), params["w3"].astype(cd),
                   preferred_element_type=jnp.float32)


if __name__ == "__main__":
    key = jax.random.PRNGKey(0)
    batch, state_dim, hidden_size, action_dim = 2, 16, 32, 8

    kx, kp = jax.random.split(key)
    x = jax.random.normal(kx, (batch, state_dim), jnp.float32)
    params = init_actor_params(kp, state_dim, hidden_size, action_dim)

    # Exactness check with f32 operands.
    out_f32 = jax.block_until_ready(actor_forward(x, params, compute_dtype=jnp.float32))
    ref_f32 = actor_ref(x, params, compute_dtype=jnp.float32)
    assert out_f32.shape == (batch, action_dim)
    assert jnp.allclose(out_f32, ref_f32, atol=1e-5, rtol=1e-5)

    # Default (perf) path: bf16 matmul operands, f32 accumulation / elementwise.
    out_bf16 = jax.block_until_ready(actor_forward(x, params))
    ref_bf16 = actor_ref(x, params, compute_dtype=jnp.bfloat16)
    assert out_bf16.shape == (batch, action_dim)
    assert jnp.allclose(out_bf16, ref_bf16, atol=1e-5, rtol=1e-5)
    # bf16 operand rounding vs the f32 reference stays well inside MLP tolerance.
    assert jnp.allclose(out_bf16, ref_f32, atol=5e-3, rtol=5e-2)

    print("KERNEL_OK")
</pallas_src>

<mosaic_0001>
module attributes {stable_mosaic.version = 11 : i64} {
  func.func @actor_kernel(%arg0: i32, %arg1: memref<8x128xf32, #tpu.memory_space<vmem>>, %arg2: memref<128x128xf32, #tpu.memory_space<vmem>>, %arg3: memref<1x128xf32, #tpu.memory_space<vmem>>, %arg4: memref<128x128xf32, #tpu.memory_space<vmem>>, %arg5: memref<1x128xf32, #tpu.memory_space<vmem>>, %arg6: memref<128x128xf32, #tpu.memory_space<vmem>>, %arg7: memref<8x128xf32, #tpu.memory_space<vmem>>) attributes {dimension_semantics = [#tpu.dimension_semantics<parallel>], iteration_bounds = array<i64: 1>, scalar_prefetch = 0 : i64, scratch_operands = 0 : i64, tpu.core_type = #tpu.core_type<tc>, window_params = [{transform_indices = @transform_0, window_bounds = array<i64: 8, 128>}, {pipeline_mode = #tpu.pipeline_mode<synchronous>, transform_indices = @transform_1, window_bounds = array<i64: 128, 128>}, {pipeline_mode = #tpu.pipeline_mode<synchronous>, transform_indices = @transform_2, window_bounds = array<i64: 1, 128>}, {pipeline_mode = #tpu.pipeline_mode<synchronous>, transform_indices = @transform_3, window_bounds = array<i64: 128, 128>}, {pipeline_mode = #tpu.pipeline_mode<synchronous>, transform_indices = @transform_4, window_bounds = array<i64: 1, 128>}, {pipeline_mode = #tpu.pipeline_mode<synchronous>, transform_indices = @transform_5, window_bounds = array<i64: 128, 128>}, {transform_indices = @transform_6, window_bounds = array<i64: 8, 128>}]} {
    %c0 = arith.constant 0 : index
    %c0_0 = arith.constant 0 : index
    %0 = vector.load %arg3[%c0, %c0_0] : memref<1x128xf32, #tpu.memory_space<vmem>>, vector<1x128xf32>
    %c0_1 = arith.constant 0 : index
    %c0_2 = arith.constant 0 : index
    %1 = vector.load %arg5[%c0_1, %c0_2] : memref<1x128xf32, #tpu.memory_space<vmem>>, vector<1x128xf32>
    %c0_3 = arith.constant 0 : index
    %c0_4 = arith.constant 0 : index
    %2 = vector.load %arg1[%c0_3, %c0_4] : memref<8x128xf32, #tpu.memory_space<vmem>>, vector<8x128xf32>
    %c0_5 = arith.constant 0 : index
    %c0_6 = arith.constant 0 : index
    %3 = vector.load %arg2[%c0_5, %c0_6] : memref<128x128xf32, #tpu.memory_space<vmem>>, vector<128x128xf32>
    %cst = arith.constant dense<0.000000e+00> : vector<8x128xf32>
    %4 = tpu.matmul %2, %3, %cst {dimension_numbers = #tpu.dot_dimension_numbers<[1], [0], [0], [1], [0, 0, 1, 1], [], []>} : vector<8x128xf32>, vector<128x128xf32>, vector<8x128xf32> -> vector<8x128xf32>
    %5 = vector.broadcast %0 : vector<1x128xf32> to vector<8x128xf32>
    %6 = arith.addf %4, %5 : vector<8x128xf32>
    %cst_7 = arith.constant 0.000000e+00 : f32
    %7 = vector.broadcast %cst_7 : f32 to vector<8x128xf32>
    %8 = arith.maximumf %6, %7 : vector<8x128xf32>
    %c0_8 = arith.constant 0 : index
    %c0_9 = arith.constant 0 : index
    %9 = vector.load %arg4[%c0_8, %c0_9] : memref<128x128xf32, #tpu.memory_space<vmem>>, vector<128x128xf32>
    %cst_10 = arith.constant dense<0.000000e+00> : vector<8x128xf32>
    %10 = tpu.matmul %8, %9, %cst_10 {dimension_numbers = #tpu.dot_dimension_numbers<[1], [0], [0], [1], [0, 0, 1, 1], [], []>} : vector<8x128xf32>, vector<128x128xf32>, vector<8x128xf32> -> vector<8x128xf32>
    %11 = vector.broadcast %1 : vector<1x128xf32> to vector<8x128xf32>
    %12 = arith.addf %10, %11 : vector<8x128xf32>
    %cst_11 = arith.constant 0.000000e+00 : f32
    %13 = vector.broadcast %cst_11 : f32 to vector<8x128xf32>
    %14 = arith.maximumf %12, %13 : vector<8x128xf32>
    %c0_12 = arith.constant 0 : index
    %c0_13 = arith.constant 0 : index
    %15 = vector.load %arg6[%c0_12, %c0_13] : memref<128x128xf32, #tpu.memory_space<vmem>>, vector<128x128xf32>
    %cst_14 = arith.constant dense<0.000000e+00> : vector<8x128xf32>
    %16 = tpu.matmul %14, %15, %cst_14 {dimension_numbers = #tpu.dot_dimension_numbers<[1], [0], [0], [1], [0, 0, 1, 1], [], []>} : vector<8x128xf32>, vector<128x128xf32>, vector<8x128xf32> -> vector<8x128xf32>
    %c0_15 = arith.constant 0 : index
    %c0_16 = arith.constant 0 : index
    %17 = vector.load %arg7[%c0_15, %c0_16] : memref<8x128xf32, #tpu.memory_space<vmem>>, vector<8x128xf32>
    tpu.vector_store %arg7[%c0_15, %c0_16], %16 {strides = array<i32>} : memref<8x128xf32, #tpu.memory_space<vmem>>, vector<8x128xf32>,
    return
  }
  func.func @transform_0(%arg0: i32) -> (i32, i32) {
    %c0_i32 = arith.constant 0 : i32
    %c0_i32_0 = arith.constant 0 : i32
    return %arg0, %c0_i32 : i32, i32
  }
  func.func @transform_1(%arg0: i32) -> (i32, i32) {
    %c0_i32 = arith.constant 0 : i32
    %c0_i32_0 = arith.constant 0 : i32
    %c0_i32_1 = arith.constant 0 : i32
    return %c0_i32, %c0_i32_0 : i32, i32
  }
  func.func @transform_2(%arg0: i32) -> (i32, i32) {
    %c0_i32 = arith.constant 0 : i32
    %c0_i32_0 = arith.constant 0 : i32
    %c0_i32_1 = arith.constant 0 : i32
    return %c0_i32, %c0_i32_0 : i32, i32
  }
  func.func @transform_3(%arg0: i32) -> (i32, i32) {
    %c0_i32 = arith.constant 0 : i32
    %c0_i32_0 = arith.constant 0 : i32
    %c0_i32_1 = arith.constant 0 : i32
    return %c0_i32, %c0_i32_0 : i32, i32
  }
  func.func @transform_4(%arg0: i32) -> (i32, i32) {
    %c0_i32 = arith.constant 0 : i32
    %c0_i32_0 = arith.constant 0 : i32
    %c0_i32_1 = arith.constant 0 : i32
    return %c0_i32, %c0_i32_0 : i32, i32
  }
  func.func @transform_5(%arg0: i32) -> (i32, i32) {
    %c0_i32 = arith.constant 0 : i32
    %c0_i32_0 = arith.constant 0 : i32
    %c0_i32_1 = arith.constant 0 : i32
    return %c0_i32, %c0_i32_0 : i32, i32
  }
  func.func @transform_6(%arg0: i32) -> (i32, i32) {
    %c0_i32 = arith.constant 0 : i32
    %c0_i32_0 = arith.constant 0 : i32
    return %arg0, %c0_i32 : i32, i32
  }
}

</mosaic_0001>

<bundles_post_ra>
// kernel: actor_forward.1
= control target key start
LH: loop header
LB: loop body
LE: loop exit
PB: predicated region body
PF: predicated region fallthrough
CT: control target
= control target key end

     0   :  { %s340_s1 = inlined_call_operand.vmem [shape: f32[128,128], index: 1, kind: input, shape index: {}]   ;;  %s341_s3 = inlined_call_operand.vmem [shape: f32[128,128], index: 3, kind: input, shape index: {}]   ;;  %s342_s2 = inlined_call_operand.vmem [shape: f32[1,128], index: 2, kind: input, shape index: {}]   ;;  %s343_s0 = inlined_call_operand.vmem [shape: f32[8,128], index: 0, kind: input, shape index: {}]   ;;  %s344_s4 = inlined_call_operand.vmem [shape: f32[1,128], index: 4, kind: input, shape index: {}]   ;;  %s345_s5 = inlined_call_operand.vmem [shape: f32[128,128], index: 5, kind: input, shape index: {}]   ;;  %s346_s6 = inlined_call_operand.vmem [shape: f32[8,128], index: 6, kind: output, shape index: {}]  }
   0x1   :  { %v41_v0 = vld [vmem:[%s340_s1 + $0x78] sm:$0xff]  ;;  %v40_v1 = vld [vmem:[%s340_s1 + $0x70] sm:$0xff]  ;;  %v39_v2 = vld [vmem:[%s340_s1 + $0x68] sm:$0xff] }
   0x2   :  { %45 = vmatpush.msra.mxu0 %v41_v0  ;;  %v38_v3 = vld [vmem:[%s340_s1 + $0x60] sm:$0xff]  ;;  %v81_v4 = vld [vmem:[%s341_s3 + $0x78] sm:$0xff]  ;;  %v80_v6 = vld [vmem:[%s341_s3 + $0x70] sm:$0xff] }
   0x3   :  { %v37_v5 = vld [vmem:[%s340_s1 + $0x58] sm:$0xff]  ;;  %85 = vmatpush.msra.mxu1 %v81_v4  ;;  %v79_v7 = vld [vmem:[%s341_s3 + $0x68] sm:$0xff]  ;;  %v36_v8 = vld [vmem:[%s340_s1 + $0x50] sm:$0xff] }
   0x4   :  { %46 = vmatpush.msra.mxu0 %v40_v1  ;;  %v78_v9 = vld [vmem:[%s341_s3 + $0x60] sm:$0xff]  ;;  %v35_v10 = vld [vmem:[%s340_s1 + $0x48] sm:$0xff]  ;;  %v77_v11 = vld [vmem:[%s341_s3 + $0x58] sm:$0xff] }
   0x5   :  { %86 = vmatpush.msra.mxu1 %v80_v6  ;;  %v34_v12 = vld [vmem:[%s340_s1 + $0x40] sm:$0xff]  ;;  %v76_v13 = vld [vmem:[%s341_s3 + $0x50] sm:$0xff]  ;;  %v33_v14 = vld [vmem:[%s340_s1 + $0x38] sm:$0xff] }
   0x6   :  { %47 = vmatpush.msra.mxu0 %v39_v2  ;;  %v75_v15 = vld [vmem:[%s341_s3 + $0x48] sm:$0xff]  ;;  %v32_v16 = vld [vmem:[%s340_s1 + $0x30] sm:$0xff]  ;;  %v74_v17 = vld [vmem:[%s341_s3 + $0x40] sm:$0xff] }
   0x7   :  { %87 = vmatpush.msra.mxu1 %v79_v7  ;;  %v31_v18 = vld [vmem:[%s340_s1 + $0x28] sm:$0xff]  ;;  %v73_v19 = vld [vmem:[%s341_s3 + $0x38] sm:$0xff]  ;;  %v30_v20 = vld [vmem:[%s340_s1 + $0x20] sm:$0xff] }
   0x8   :  { %48 = vmatpush.msra.mxu0 %v38_v3  ;;  %v72_v21 = vld [vmem:[%s341_s3 + $0x30] sm:$0xff]  ;;  %v29_v22 = vld [vmem:[%s340_s1 + $0x18] sm:$0xff]  ;;  %v71_v23 = vld [vmem:[%s341_s3 + $0x28] sm:$0xff] }
   0x9   :  { %88 = vmatpush.msra.mxu1 %v78_v9  ;;  %v28_v24 = vld [vmem:[%s340_s1 + $0x10] sm:$0xff]  ;;  %v70_v25 = vld [vmem:[%s341_s3 + $0x20] sm:$0xff]  ;;  %v27_v26 = vld [vmem:[%s340_s1 + $0x8] sm:$0xff] }
   0xa   :  { %49 = vmatpush.msra.mxu0 %v37_v5  ;;  %v69_v27 = vld [vmem:[%s341_s3 + $0x18] sm:$0xff]  ;;  %v26_v28 = vld [vmem:[%s340_s1] sm:$0xff]  ;;  %v68_v30 = vld [vmem:[%s341_s3 + $0x10] sm:$0xff] }
   0xb   :  { %89 = vmatpush.msra.mxu1 %v77_v11  ;;  %v25_v29 = vld [vmem:[%s343_s0] sm:$0xff]  ;;  %v67_v31 = vld [vmem:[%s341_s3 + $0x8] sm:$0xff]  ;;  %v121_v33 = vld [vmem:[%s345_s5 + $0x78] sm:$0xff] }
   0xc   :  { %50 = vmatpush.msra.mxu0 %v36_v8  ;;  %v66_v32 = vld [vmem:[%s341_s3] sm:$0xff]  ;;  %v120_v34 = vld [vmem:[%s345_s5 + $0x70] sm:$0xff]  ;;  %122 = vmatpush.msra.mxu2 %v121_v33  ;;  %v119_v35 = vld [vmem:[%s345_s5 + $0x68] sm:$0xff] }
   0xd   :  { %90 = vmatpush.msra.mxu1 %v76_v13  ;;  %v118_v36 = vld [vmem:[%s345_s5 + $0x60] sm:$0xff]  ;;  %v117_v37 = vld [vmem:[%s345_s5 + $0x58] sm:$0xff]  ;;  %v116_v38 = vld [vmem:[%s345_s5 + $0x50] sm:$0xff] }
   0xe   :  { %51 = vmatpush.msra.mxu0 %v35_v10  ;;  %123 = vmatpush.msra.mxu2 %v120_v34  ;;  %v115_v39 = vld [vmem:[%s345_s5 + $0x48] sm:$0xff]  ;;  %v114_v40 = vld [vmem:[%s345_s5 + $0x40] sm:$0xff]  ;;  %v113_v41 = vld [vmem:[%s345_s5 + $0x38] sm:$0xff] }
   0xf   :  { %91 = vmatpush.msra.mxu1 %v75_v15  ;;  %v112_v42 = vld [vmem:[%s345_s5 + $0x30] sm:$0xff]  ;;  %v111_v43 = vld [vmem:[%s345_s5 + $0x28] sm:$0xff]  ;;  %v110_v44 = vld [vmem:[%s345_s5 + $0x20] sm:$0xff] }
  0x10   :  { %52 = vmatpush.msra.mxu0 %v34_v12  ;;  %124 = vmatpush.msra.mxu2 %v119_v35  ;;  %v109_v45 = vld [vmem:[%s345_s5 + $0x18] sm:$0xff]  ;;  %v147_v46 = vld [vmem:[%s342_s2] ss:$0 sm:$0xff]  ;;  %v108_v50 = vld [vmem:[%s345_s5 + $0x10] sm:$0xff] }
  0x11   :  { %92 = vmatpush.msra.mxu1 %v74_v17  ;;  %v107_v51 = vld [vmem:[%s345_s5 + $0x8] sm:$0xff]  ;;  %v106_v52 = vld [vmem:[%s345_s5] sm:$0xff] }
  0x12   :  { %53 = vmatpush.msra.mxu0 %v33_v14  ;;  %125 = vmatpush.msra.mxu2 %v118_v36  ;;  %v148_v53 = vld [vmem:[%s344_s4] ss:$0 sm:$0xff] }
  0x13   :  { %93 = vmatpush.msra.mxu1 %v73_v19 }
  0x14   :  { %54 = vmatpush.msra.mxu0 %v32_v16  ;;  %126 = vmatpush.msra.mxu2 %v117_v37 }
  0x15   :  { %94 = vmatpush.msra.mxu1 %v72_v21 }
  0x16   :  { %55 = vmatpush.msra.mxu0 %v31_v18  ;;  %127 = vmatpush.msra.mxu2 %v116_v38 }
  0x17   :  { %95 = vmatpush.msra.mxu1 %v71_v23 }
  0x18   :  { %56 = vmatpush.msra.mxu0 %v30_v20  ;;  %128 = vmatpush.msra.mxu2 %v115_v39 }
  0x19   :  { %96 = vmatpush.msra.mxu1 %v70_v25 }
  0x1a   :  { %57 = vmatpush.msra.mxu0 %v29_v22  ;;  %129 = vmatpush.msra.mxu2 %v114_v40 }
  0x1b   :  { %97 = vmatpush.msra.mxu1 %v69_v27 }
  0x1c   :  { %58 = vmatpush.msra.mxu0 %v28_v24  ;;  %130 = vmatpush.msra.mxu2 %v113_v41 }
  0x1d   :  { %98 = vmatpush.msra.mxu1 %v68_v30 }
  0x1e   :  { %59 = vmatpush.msra.mxu0 %v27_v26  ;;  %131 = vmatpush.msra.mxu2 %v112_v42 }
  0x1f   :  { %99 = vmatpush.msra.mxu1 %v67_v31 }
  0x20   :  { %60 = vmatpush.msra.mxu0 %v26_v28  ;;  %132 = vmatpush.msra.mxu2 %v111_v43 }
  0x21   :  { %61 = vmatmul.f32.vlgmr.msra.gmra.mxu0 %v25_v29  ;;  %100 = vmatpush.msra.mxu1 %v66_v32 }
  0x22   :  { %133 = vmatpush.msra.mxu2 %v110_v44 }
  0x24   :  { %134 = vmatpush.msra.mxu2 %v109_v45 }
  0x26   :  { %135 = vmatpush.msra.mxu2 %v108_v50 }
  0x28   :  { %136 = vmatpush.msra.mxu2 %v107_v51 }
  0x2a   :  { %137 = vmatpush.msra.mxu2 %v106_v52 }
  0x9e   :  { %v62_v47 = vpop.f32.mrf.mxu0 }
  0x9f   :  { %v63_v48 = vadd.f32 %v147_v46, %v62_v47 }
  0xa1   :  { %v65_v49 = vmax.f32 %v63_v48, 0.0 }
  0xa3   :  { %101 = vmatmul.f32.vlgmr.msra.gmra.mxu1 %v65_v49 }
 0x120   :  { %v102_v54 = vpop.f32.mrf.mxu1 }
 0x121   :  { %v103_v55 = vadd.f32 %v148_v53, %v102_v54 }
 0x123   :  { %v105_v56 = vmax.f32 %v103_v55, 0.0 }
 0x125   :  { %138 = vmatmul.f32.vlgmr.msra.gmra.mxu2 %v105_v56 }
 0x1a8   :  { %v139_v57 = vpop.f32.mrf.mxu2 }
 0x1a9   :  { %142 = vst [vmem:[%s346_s6] sm:$0xff] %v139_v57 }

</bundles_post_ra>
